<compile_context>
chip_gen: v7x
topology: tpu7x:2x2x1
jax: 0.10.0
libtpu: 0.0.40
codegen_flags: <defaults>
</compile_context>

<pallas_src>
import jax
import jax.numpy as jnp
from jax.experimental import pallas as pl
from jax.experimental.pallas import tpu as pltpu

LANE = 128


# ---------------------------------------------------------------------------
# small helpers
# ---------------------------------------------------------------------------
def _round_up(x, m):
    return ((x + m - 1) // m) * m


def _pick_tile(dim, candidates):
    # largest candidate that evenly divides `dim`; fall back to the full axis
    for t in candidates:
        if t <= dim and dim % t == 0:
            return t
    return dim


def _pad2(x, rows, cols):
    r, c = x.shape
    return jnp.pad(x, ((0, rows - r), (0, cols - c)))


# ---------------------------------------------------------------------------
# Pallas kernels
# ---------------------------------------------------------------------------
def _project_kernel(ego_ref, w_ref, x_ref):
    # X = ego @ W_gcn.  By associativity Graph @ (ego @ W) == (Graph @ ego) @ W,
    # so the big kernel's K-loop stays a single MXU stream over Graph tiles.
    x_ref[...] = jnp.dot(ego_ref[...], w_ref[...],
                         preferred_element_type=jnp.float32).astype(x_ref.dtype)


def _gcn_block_kernel(g_ref, x_ref, bg_ref, wm_ref, bm_ref,
                      ego_out_ref, norm_out_ref, acc_ref):
    k = pl.program_id(1)

    @pl.when(k == 0)
    def _init():
        acc_ref[...] = jnp.zeros_like(acc_ref)

    # acc += GraphTile @ X_k  (bf16 x bf16 -> f32 accumulate)
    acc_ref[...] += jnp.dot(g_ref[...], x_ref[...],
                            preferred_element_type=jnp.float32)

    @pl.when(k == pl.num_programs(1) - 1)
    def _epilogue():
        # gcn = LeakyReLU(Graph @ ego @ W_gcn + b_gcn, negative_slope=0.2)
        gcn = acc_ref[...] + bg_ref[...]
        gcn = jnp.where(gcn > 0, gcn, 0.2 * gcn)
        # mlp = gcn @ W_mlp + b_mlp
        mlp = jnp.dot(gcn, wm_ref[...],
                      preferred_element_type=jnp.float32) + bm_ref[...]
        # TODO(synk): mess_dropout applied as identity (deterministic / eval mode).
        ego_out_ref[...] = mlp
        # F.normalize(x, p=2, dim=1) == x * rsqrt(max(sum(x^2), eps^2)), eps=1e-12
        sumsq = jnp.sum(mlp * mlp, axis=1, keepdims=True)
        norm_out_ref[...] = mlp * jax.lax.rsqrt(jnp.maximum(sumsq, 1e-24))


def _loss_kernel(u_ref, p_ref, n_ref, eu_ref, ep_ref, en_ref,
                 bpr_ref, reg_ref):
    i = pl.program_id(0)

    @pl.when(i == 0)
    def _init():
        bpr_ref[0, 0] = jnp.float32(0.0)
        reg_ref[0, 0] = jnp.float32(0.0)

    u = u_ref[...]
    p = p_ref[...]
    n = n_ref[...]
    pos = jnp.sum(u * p, axis=1, keepdims=True)               # (TB, 1)
    neg = jnp.sum(u * n, axis=1, keepdims=True)               # (TB, 1)
    diff = neg - pos
    # numerically-stable softplus(diff) = -logsigmoid(pos - neg)
    sp = jnp.maximum(diff, 0.0) + jnp.log1p(jnp.exp(-jnp.abs(diff)))
    bpr_ref[0, 0] += jnp.sum(sp)

    eu = eu_ref[...]
    ep = ep_ref[...]
    en = en_ref[...]
    reg = jnp.sum(eu * eu) + jnp.sum(ep * ep) + jnp.sum(en * en)
    reg_ref[0, 0] += 0.5 * reg


# ---------------------------------------------------------------------------
# Pallas wrappers
# ---------------------------------------------------------------------------
def project(ego, w, *, tm=None):
    """X = ego @ W_gcn, output in bf16 for the subsequent graph matmul."""
    n, din = ego.shape
    d = w.shape[1]
    if tm is None or n % tm:
        tm = _pick_tile(n, (1024, 512, 256, 128, 64, 32, 16, 8))
    return pl.pallas_call(
        _project_kernel,
        out_shape=jax.ShapeDtypeStruct((n, d), jnp.bfloat16),
        grid_spec=pltpu.PrefetchScalarGridSpec(
            num_scalar_prefetch=0,
            grid=(n // tm,),
            in_specs=[pl.BlockSpec((tm, din), lambda i: (i, 0)),
                      pl.BlockSpec((din, d), lambda i: (0, 0))],
            out_specs=pl.BlockSpec((tm, d), lambda i: (i, 0)),
        ),
        compiler_params=pltpu.CompilerParams(
            dimension_semantics=("parallel",)),
    )(ego, w)


def gcn_block(graph_block, x, b_gcn, w_mlp, b_mlp, *, tm=None, tk=None):
    """One bipartite block of the GCN layer: (G_block @ x) -> epilogue."""
    m, k_dim = graph_block.shape
    d = x.shape[1]
    assert x.shape[0] == k_dim
    if tm is None or m % tm:
        tm = _pick_tile(m, (1024, 512, 256, 128, 64, 32, 16, 8))
    if tk is None or k_dim % tk:
        tk = _pick_tile(k_dim, (2048, 1024, 512, 256, 128))
    grid = (m // tm, k_dim // tk)

    flops = 2 * m * k_dim * d + 2 * m * d * d
    bytes_accessed = (m * k_dim * graph_block.dtype.itemsize
                      + grid[0] * k_dim * d * x.dtype.itemsize
                      + 2 * m * d * 4 + d * d * 4 + 2 * d * 4)

    return pl.pallas_call(
        _gcn_block_kernel,
        out_shape=(jax.ShapeDtypeStruct((m, d), jnp.float32),
                   jax.ShapeDtypeStruct((m, d), jnp.float32)),
        grid_spec=pltpu.PrefetchScalarGridSpec(
            num_scalar_prefetch=0,
            grid=grid,
            in_specs=[
                pl.BlockSpec((tm, tk), lambda i, k: (i, k)),   # Graph tile
                pl.BlockSpec((tk, d), lambda i, k: (k, 0)),    # X tile
                pl.BlockSpec((1, d), lambda i, k: (0, 0)),     # b_gcn
                pl.BlockSpec((d, d), lambda i, k: (0, 0)),     # W_mlp
                pl.BlockSpec((1, d), lambda i, k: (0, 0)),     # b_mlp
            ],
            out_specs=(pl.BlockSpec((tm, d), lambda i, k: (i, 0)),
                       pl.BlockSpec((tm, d), lambda i, k: (i, 0))),
            scratch_shapes=[pltpu.VMEM((tm, d), jnp.float32)],
        ),
        compiler_params=pltpu.CompilerParams(
            dimension_semantics=("parallel", "arbitrary")),
        cost_estimate=pl.CostEstimate(flops=int(flops), transcendentals=0,
                                      bytes_accessed=int(bytes_accessed)),
    )(graph_block, x, b_gcn, w_mlp, b_mlp)


def gcmc_losses(u, p, n, eu, ep, en, *, tb=None):
    """Returns (sum softplus(neg-pos), 0.5 * sum ||ego||^2) as (1,1) scalars."""
    b, df = u.shape
    de = eu.shape[1]
    if tb is None or b % tb:
        tb = _pick_tile(b, (512, 256, 128, 64, 32, 16, 8))
    smem_out = pl.BlockSpec(memory_space=pltpu.MemorySpace.SMEM)
    return pl.pallas_call(
        _loss_kernel,
        out_shape=(jax.ShapeDtypeStruct((1, 1), jnp.float32),
                   jax.ShapeDtypeStruct((1, 1), jnp.float32)),
        grid_spec=pltpu.PrefetchScalarGridSpec(
            num_scalar_prefetch=0,
            grid=(b // tb,),
            in_specs=[
                pl.BlockSpec((tb, df), lambda i: (i, 0)),
                pl.BlockSpec((tb, df), lambda i: (i, 0)),
                pl.BlockSpec((tb, df), lambda i: (i, 0)),
                pl.BlockSpec((tb, de), lambda i: (i, 0)),
                pl.BlockSpec((tb, de), lambda i: (i, 0)),
                pl.BlockSpec((tb, de), lambda i: (i, 0)),
            ],
            out_specs=(smem_out, smem_out),
        ),
        compiler_params=pltpu.CompilerParams(
            dimension_semantics=("arbitrary",)),
    )(u, p, n, eu, ep, en)


# ---------------------------------------------------------------------------
# GCMC model (JAX glue around the Pallas hot path)
# ---------------------------------------------------------------------------
def aggregate(r_ui, r_iu, params, num_users, n_layers, layer_sizes,
              *, tm=None, tk=None):
    ego = jnp.concatenate([params["user_embedding"],
                           params["item_embedding"]], axis=0)
    all_embeddings = [ego]
    dpad = _round_up(max(layer_sizes), LANE)
    ego_pad = _pad2(ego, ego.shape[0], dpad)

    for layer in range(n_layers):
        dout = layer_sizes[layer + 1]
        wg = _pad2(params["W_gcn_%d" % layer], dpad, dpad)
        bg = _pad2(params["b_gcn_%d" % layer], 1, dpad)
        wm = _pad2(params["W_mlp_%d" % layer], dpad, dpad)
        bm = _pad2(params["b_mlp_%d" % layer], 1, dpad)

        # feature pre-projection once per layer:  Graph @ (ego @ W_gcn)
        x = project(ego_pad, wg, tm=tm)
        x_users, x_items = x[:num_users], x[num_users:]

        # bipartite structure: user rows see only item features and vice versa
        ego_u, norm_u = gcn_block(r_ui, x_items, bg, wm, bm, tm=tm, tk=tk)
        ego_i, norm_i = gcn_block(r_iu, x_users, bg, wm, bm, tm=tm, tk=tk)

        ego_pad = jnp.concatenate([ego_u, ego_i], axis=0)
        norm = jnp.concatenate([norm_u, norm_i], axis=0)
        all_embeddings.append(norm[:, :dout])

    final = jnp.concatenate(all_embeddings, axis=1)
    return final[:num_users], final[num_users:]


def gcmc_forward(params, r_ui, r_iu, user, positive, negative,
                 num_users, n_layers, layer_sizes, reg_lambda,
                 *, tm=None, tk=None, loss_tb=None):
    users_emb, items_emb = aggregate(r_ui, r_iu, params, num_users,
                                     n_layers, layer_sizes, tm=tm, tk=tk)
    user_embedding = jnp.take(users_emb, user, axis=0)
    pos_embedding = jnp.take(items_emb, positive, axis=0)
    neg_embedding = jnp.take(items_emb, negative, axis=0)
    ego_user_emb = jnp.take(params["user_embedding"], user, axis=0)
    ego_pos_emb = jnp.take(params["item_embedding"], positive, axis=0)
    ego_neg_emb = jnp.take(params["item_embedding"], negative, axis=0)

    bpr_sum, reg_sum = gcmc_losses(user_embedding, pos_embedding, neg_embedding,
                                   ego_user_emb, ego_pos_emb, ego_neg_emb,
                                   tb=loss_tb)
    batch = user.shape[0]
    bpr_loss = bpr_sum[0, 0] / batch
    reg_loss = reg_lambda * (reg_sum[0, 0] / batch)
    return [bpr_loss, reg_loss]


# ---------------------------------------------------------------------------
# Deterministic parameter / graph construction
# ---------------------------------------------------------------------------
def xavier_uniform(key, shape):
    # torch.nn.init.xavier_uniform_ : U(-a, a), a = sqrt(6 / (fan_in + fan_out))
    bound = (6.0 / (shape[0] + shape[1])) ** 0.5
    return jax.random.uniform(key, shape, minval=-bound, maxval=bound,
                              dtype=jnp.float32)


def build_graph(key, num_users, num_items, density=0.1):
    # user-item block of the symmetric-normalized bipartite adjacency
    # D^{-1/2} A D^{-1/2}; user-user / item-item blocks are structurally zero.
    # TODO(synk): dense stand-in for the sparse COO adjacency of the dataset.
    r = (jax.random.uniform(key, (num_users, num_items)) < density
         ).astype(jnp.float32)
    du = jnp.sum(r, axis=1)
    di = jnp.sum(r, axis=0)
    du_is = jnp.where(du > 0, 1.0 / jnp.sqrt(jnp.maximum(du, 1e-12)), 0.0)
    di_is = jnp.where(di > 0, 1.0 / jnp.sqrt(jnp.maximum(di, 1e-12)), 0.0)
    return (du_is[:, None] * r * di_is[None, :]).astype(jnp.float32)


if __name__ == "__main__":
    # small synthetic config consistent with the module's __init__
    num_users, num_items = 384, 256
    embedding_size = 32
    layer_sizes = [embedding_size, 32, 32]    # [emb] + eval(layer_size)
    n_layers = 2                              # GCN_layer
    reg_lambda = 1e-4
    batch = 64

    root = jax.random.PRNGKey(0)
    keys = jax.random.split(root, 2 + 4 * n_layers + 3)

    params = {
        "user_embedding": xavier_uniform(keys[0], (num_users, embedding_size)),
        "item_embedding": xavier_uniform(keys[1], (num_items, embedding_size)),
    }
    ki = 2
    for layer in range(n_layers):
        din, dout = layer_sizes[layer], layer_sizes[layer + 1]
        params["W_gcn_%d" % layer] = xavier_uniform(keys[ki], (din, dout)); ki += 1
        params["b_gcn_%d" % layer] = xavier_uniform(keys[ki], (1, dout)); ki += 1
        params["W_mlp_%d" % layer] = xavier_uniform(keys[ki], (din, dout)); ki += 1
        params["b_mlp_%d" % layer] = xavier_uniform(keys[ki], (1, dout)); ki += 1

    r_norm = build_graph(keys[ki], num_users, num_items); ki += 1
    # bf16 stream of the adjacency halves the dominant HBM traffic; the matmul
    # still accumulates in f32 (preferred_element_type) on the MXU.
    r_ui = r_norm.astype(jnp.bfloat16)          # user rows   [U, I]
    r_iu = r_norm.T.astype(jnp.bfloat16)        # item rows   [I, U]

    user = jax.random.randint(keys[ki], (batch,), 0, num_users, dtype=jnp.int32); ki += 1
    positive = jax.random.randint(keys[ki], (batch,), 0, num_items, dtype=jnp.int32)
    negative = (positive + 3) % num_items

    # small tiles (128) chosen so the grids are non-trivial even at demo sizes;
    # at real dataset sizes leave tm/tk=None to pick larger pipelined tiles.
    loss_list = gcmc_forward(params, r_ui, r_iu, user, positive, negative,
                             num_users, n_layers, layer_sizes, reg_lambda,
                             tm=128, tk=128, loss_tb=32)
    loss_list = [jax.block_until_ready(x) for x in loss_list]

    assert all(bool(jnp.isfinite(x)) for x in loss_list)
    print("KERNEL_OK")
</pallas_src>

<mosaic_0001>
module attributes {stable_mosaic.version = 11 : i64} {
  func.func @_project_kernel(%arg0: i32, %arg1: memref<128x128xf32, #tpu.memory_space<vmem>>, %arg2: memref<128x128xf32, #tpu.memory_space<vmem>>, %arg3: memref<128x128xbf16, #tpu.memory_space<vmem>>) attributes {dimension_semantics = [#tpu.dimension_semantics<parallel>], iteration_bounds = array<i64: 5>, scalar_prefetch = 0 : i64, scratch_operands = 0 : i64, tpu.core_type = #tpu.core_type<tc>, window_params = [{transform_indices = @transform_0, window_bounds = array<i64: 128, 128>}, {pipeline_mode = #tpu.pipeline_mode<synchronous>, transform_indices = @transform_1, window_bounds = array<i64: 128, 128>}, {transform_indices = @transform_2, window_bounds = array<i64: 128, 128>}]} {
    %c0 = arith.constant 0 : index
    %c0_0 = arith.constant 0 : index
    %0 = vector.load %arg1[%c0, %c0_0] : memref<128x128xf32, #tpu.memory_space<vmem>>, vector<128x128xf32>
    %c0_1 = arith.constant 0 : index
    %c0_2 = arith.constant 0 : index
    %1 = vector.load %arg2[%c0_1, %c0_2] : memref<128x128xf32, #tpu.memory_space<vmem>>, vector<128x128xf32>
    %cst = arith.constant dense<0.000000e+00> : vector<128x128xf32>
    %2 = tpu.matmul %0, %1, %cst {dimension_numbers = #tpu.dot_dimension_numbers<[1], [0], [0], [1], [0, 0, 1, 1], [], []>} : vector<128x128xf32>, vector<128x128xf32>, vector<128x128xf32> -> vector<128x128xf32>
    %3 = arith.truncf %2 : vector<128x128xf32> to vector<128x128xbf16>
    %c0_3 = arith.constant 0 : index
    %c0_4 = arith.constant 0 : index
    %4 = vector.load %arg3[%c0_3, %c0_4] : memref<128x128xbf16, #tpu.memory_space<vmem>>, vector<128x128xbf16>
    tpu.vector_store %arg3[%c0_3, %c0_4], %3 {strides = array<i32>} : memref<128x128xbf16, #tpu.memory_space<vmem>>, vector<128x128xbf16>,
    return
  }
  func.func @transform_0(%arg0: i32) -> (i32, i32) {
    %c0_i32 = arith.constant 0 : i32
    %c0_i32_0 = arith.constant 0 : i32
    return %arg0, %c0_i32 : i32, i32
  }
  func.func @transform_1(%arg0: i32) -> (i32, i32) {
    %c0_i32 = arith.constant 0 : i32
    %c0_i32_0 = arith.constant 0 : i32
    %c0_i32_1 = arith.constant 0 : i32
    return %c0_i32, %c0_i32_0 : i32, i32
  }
  func.func @transform_2(%arg0: i32) -> (i32, i32) {
    %c0_i32 = arith.constant 0 : i32
    %c0_i32_0 = arith.constant 0 : i32
    return %arg0, %c0_i32 : i32, i32
  }
}

</mosaic_0001>

<bundles_post_ra>
// kernel: tpu_custom_call.1
= control target key start
LH: loop header
LB: loop body
LE: loop exit
PB: predicated region body
PF: predicated region fallthrough
CT: control target
= control target key end

     0   :  { %7 = vsyncpa [#allocation3], 0  ;;  %s1196_s0 = inlined_call_operand.hbm [shape: f32[640,128], index: 0, kind: input, shape index: {}]   ;;  %s1197_s1 = inlined_call_operand.hbm [shape: f32[128,128], index: 1, kind: input, shape index: {}]   ;;  %s1198_s2 = inlined_call_operand.hbm [shape: bf16[640,128], index: 2, kind: output, shape index: {}]  }
   0x1   :  { %9 = vsyncpa [#allocation3 + $0x1], 0 }
   0x2   :  { %10 = vsyncpa [#allocation6], 0 }
   0x3   :  { %11 = vsyncpa [#allocation4], 0 }
   0x4   :  { %13 = vsyncpa [#allocation4 + $0x1], 0  ;;  %s979_s9 = smov 0   ;;  %s981_s10 = smov 0  }
   0x5   :  { %s983_s11 = smov 0   ;;  %s985_s12 = smov 0  }
   0x6 LB: > { %s1000_s13 = sadd.s32 4294967295, %s955_s12   ;;  %s533_s14 = sadd.s32 4294967294, %s955_s12   ;;  %s955_s12 = sphi %s985_s12, %s1217_s12   ;;  %s951_s11 = sphi %s983_s11, %s1216_s11   ;;  %s947_s10 = sphi %s981_s10, %s1215_s10   ;;  %s943_s9 = sphi %s979_s9, %s1214_s9  }
   0x7   : > { %p39_p0 = scmp.ne.s32.totalorder %s947_s10, %s943_s9  ;;  %p1199_p1 = scmp.eq.s32.totalorder %s1000_s13, 0 }
   0x8   : > { %p90_p3 = scmp.eq.s32.totalorder %s533_s14, 4  ;;  %p534_p5 = scmp.ge.s32.totalorder %s955_s12, 1 }
   0x9   : > { %p1009_p4 = por %p1199_p1, %p39_p0  ;;  %p97_p7 = scmp.lt.s32.totalorder %s955_s12, 6 }
   0xa   : > { %p1014_p6 = por %p90_p3, %p39_p0  ;;  %s957_s18 = smov [#allocation5]  }
   0xb   : > { %s1202_s15 = scalar_select %p1009_p4, 1, 0 }
   0xc   : > { %s1203_s16 = scalar_select %p1014_p6, 1, 0 }
   0xd   : > { %p1019_p8 = pnand %p534_p5, %p97_p7  ;;  %s109_s19 = sshll.u32 %s957_s18, 4  ;;  %s110_s19 = int_to_ptr.vmem [resolvable:$true] %s109_s19 }
   0xe   : > { %s1032_s21 = sadd.s32 1, %s955_s12   ;;  %s26_s22 = sadd.s32 1, %s951_s11 }
   0xf   : > { %s1204_s17 = scalar_select %p1019_p8, 1, 0 }
  0x10   : > { %p774_p9 = pneg %p1019_p8  ;;  %s23_s23 = ssub.s32 %s955_s12, %s1032_s21 }
  0x11   : > { %s827_s26 = scalar_lea.hbm %s1197_s1, 2048 }
  0x12   : > { %p1027_p10 = pnand %p774_p9, %p1199_p1  ;;  %p828_p11 = scmp.ne.s32.totalorder %s1197_s1, %s827_s26 }
  0x13   : > { %p834_p3 = scmp.lt.u32.totalorder %s827_s26, %s1197_s1 }
  0x14   : > { %p829_p12 = pneg %p1027_p10 }
  0x16   : > { %p830_p13 = pnand %p829_p12, %p828_p11 }
  0x18   : > { %p831_p0 = pneg %p830_p13 }
  0x1a   : > { %p836_p5 = pnand %p834_p3, %p831_p0 }
  0x1c   : > { %839 = shalt.err (!%p836_p5)
}
  0x1d   : > { %s840_s3 = scalar_lea.vmem %s110_s19, 2048  ;;  %p848_p2 = scmp.lt.s32.totalorder %s110_s19, %s110_s19 }
  0x1e   : > { %p841_p7 = scmp.ne.s32.totalorder %s110_s19, %s840_s3  ;;  %p849_p6 = scmp.lt.s32.totalorder %s840_s3, %s840_s3 }
  0x20   : > { %p843_p9 = pnand %p841_p7, %p829_p12  ;;  %p850_p4 = por %p849_p6, %p848_p2 }
  0x22   : > { %p844_p1 = pneg %p843_p9 }
  0x24   : > { %p851_p8 = pnand %p850_p4, %p844_p1 }
  0x26   : > { %854 = shalt.err (!%p851_p8)
}
  0x27   : > { %s958_s4 = smov 128   ;;  %s959_s5 = smov 8  }
  0x28   : > { %777 = dma.hbm_to_vmem [thread:$0]  (!%p1027_p10), %s1197_s1, 2048, %s110_s19, [#allocation6], %s958_s4, %s958_s4, %s959_s5  }
  0x29   : > { %p24_p1 = scmp.eq.s32.totalorder %s23_s23, 0  ;;  %p33_p2 = scmp.ne.s32.totalorder %s951_s11, %s947_s10 }
  0x2a   : > { %p34_p4 = scmp.eq.s32.totalorder %s955_s12, 0  ;;  %p787_p6 = scmp.lt.s32.totalorder %s955_s12, 5 }
  0x2b   : > { %s1061_s8 = scalar_select %p24_p1, %s951_s11, %s26_s22  }
  0x2c   : > { %p35_p8 = por %p34_p4, %p33_p2  ;;  %p1206_p11 = scmp.eq.s32.totalorder %s1000_s13, 4 }
  0x2d   : > { %s123_s18 = sand.u32 1, %s951_s11   ;;  %s565_s20 = sshll.u32 %s955_s12, 11 }
  0x2e   : > { %p1065_p12 = por %p1206_p11, %p33_p2  ;;  %s537_s24 = sshll.u32 %s123_s18, 7 }
  0x2f   : > { %s1074_s27 = scalar_lea.hbm %s1196_s0, %s565_s20  ;;  %s127_s19 = scalar_lea.vmem [#allocation2], %s537_s24 }
  0x30   : > { %s134_s22 = sshll.u32 %s127_s19, 4  ;;  %p1076_p10 = pnand %p787_p6, %p35_p8  ;;  %s1080_s22 = int_to_ptr.vmem [resolvable:$true] %s134_s22 }
  0x31   : > { %s1082_s28 = scalar_lea.sflag [#allocation3], %s123_s18  ;;  %s855_s29 = scalar_lea.hbm %s1074_s27, 2048 }
  0x32   : > { %p856_p13 = scmp.ne.s32.totalorder %s1074_s27, %s855_s29  ;;  %p857_p0 = pneg %p1076_p10 }
  0x33   : > { %s860_s6 = scalar_lea.hbm %s1196_s0, 10240  ;;  %p861_p7 = scmp.lt.u32.totalorder %s1074_s27, %s1196_s0 }
  0x34   : > { %p858_p3 = pnand %p857_p0, %p856_p13  ;;  %p862_p9 = scmp.lt.u32.totalorder %s860_s6, %s855_s29 }
  0x35   : > { %p864_p2 = scmp.lt.u32.totalorder %s855_s29, %s1074_s27 }
  0x36   : > { %p859_p5 = pneg %p858_p3  ;;  %p863_p1 = por %p862_p9, %p861_p7 }
  0x38   : > { %p865_p4 = por %p864_p2, %p863_p1 }
  0x3a   : > { %p866_p6 = pnand %p865_p4, %p859_p5 }
  0x3c   : > { %869 = shalt.err (!%p866_p6)
}
  0x3d   : > { %s870_s18 = scalar_lea.vmem %s1080_s22, 2048  ;;  %s960_s24 = smov [#allocation2]  }
  0x3e   : > { %p871_p8 = scmp.ne.s32.totalorder %s1080_s22, %s870_s18  ;;  %s875_s25 = sshll.u32 %s960_s24, 4  ;;  %s876_s25 = int_to_ptr.vmem [resolvable:$false] %s875_s25 }
  0x3f   : > { %s877_s26 = scalar_lea.vmem %s876_s25, 4096  ;;  %p878_p3 = scmp.lt.s32.totalorder %s1080_s22, %s876_s25 }
  0x40   : > { %p873_p11 = pnand %p871_p8, %p857_p0  ;;  %p879_p7 = scmp.lt.s32.totalorder %s877_s26, %s870_s18 }
  0x42   : > { %p874_p13 = pneg %p873_p11  ;;  %p880_p9 = por %p879_p7, %p878_p3 }
  0x44   : > { %p881_p1 = pnand %p880_p9, %p874_p13 }
  0x46   : > { %884 = shalt.err (!%p881_p1)
}
  0x47   : > { %781 = dma.hbm_to_vmem [thread:$0]  (!%p1076_p10), %s1074_s27, 2048, %s1080_s22, %s1082_s28, %s958_s4, %s958_s4, %s959_s5  }
  0x48   : > { %p1209_p0 = scmp.ne.s32.totalorder %s1204_s17, 0 }
  0x49   : > { %s1116_s19 = sand.u32 (!%p1209_p0), 1, %s947_s10   ;;  %p1210_p5 = scmp.ne.s32.totalorder (!%p1209_p0), %s1202_s15, 0 }
  0x4a   : > { %146 = sbr.rel (%p1209_p0) target bundleno = 362 (0x16a), region = 28  ;;  %s541_s29 = sshll.u32 (!%p1209_p0), %s1116_s19, 7 }
  0x4b   : > { %s149_s30 = scalar_lea.sflag (!%p1209_p0), [#allocation3], %s1116_s19  ;;  %s1120_s3 = scalar_lea.vmem (!%p1209_p0), [#allocation2], %s541_s29 }
  0x51   : > { %930 = dma.done.wait (%p1210_p5), %s149_s30, 2048  }
  0x52   : > { %932 = vsyncadd (%p1210_p5), %s149_s30, 4294965248  ;;  %p1211_p10 = scmp.eq.s32.totalorder %s1000_s13, 0 }
  0x54   : > { %934 = dma.done.wait (%p1211_p10), [#allocation6], 2048   ;;  %p1212_p2 = pmov %p1211_p10 }
  0x55   : > { %v195_v0 = vld [vmem:[#allocation5] sm:$0xff]  ;;  %v196_v1 = vld [vmem:[#allocation5 + $0x8] sm:$0xff]  ;;  %v197_v2 = vld [vmem:[#allocation5 + $0x10] sm:$0xff]  ;;  %s543_s15 = sshll.u32 %s1116_s19, 6  ;;  %s582_s5 = sshll.u32 %s1000_s13, 10 }
  0x56   : > { %936 = vsyncadd (%p1212_p2), [#allocation6], 4294965248  ;;  %v718_v3 = vpack.c.bf16 %v196_v1, %v195_v0  ;;  %v198_v4 = vld [vmem:[#allocation5 + $0x18] sm:$0xff]  ;;  %v199_v6 = vld [vmem:[#allocation5 + $0x20] sm:$0xff]  ;;  %s176_s17 = scalar_lea.vmem [#allocation7], %s543_s15  ;;  %s1153_s23 = scalar_lea.hbm %s1198_s2, %s582_s5 }
  0x57   : > { %v722_v5 = vpack.c.bf16 %v198_v4, %v197_v2  ;;  %v200_v7 = vld [vmem:[#allocation5 + $0x28] sm:$0xff]  ;;  %v179_v9 = vld [vmem:[%s1120_s3] sm:$0xff]  ;;  %v201_v11 = vld [vmem:[#allocation5 + $0x30] sm:$0xff]  ;;  %s450_s4 = sshll.u32 %s176_s17, 4  ;;  %s437_s13 = scalar_lea.sflag [#allocation4], %s1116_s19  ;;  %s1148_s4 = int_to_ptr.vmem [resolvable:$true] %s450_s4 }
  0x58   : > { %719 = vmatprep.subr.bf16.mxu0 %v718_v3  ;;  %750 = vmatprep.subr.bf16.mxu1 %v718_v3  ;;  %v726_v8 = vpack.c.bf16 %v200_v7, %v199_v6  ;;  %v187_v10 = vld [vmem:[%s1120_s3 + $0x40] sm:$0xff]  ;;  %v202_v12 = vld [vmem:[#allocation5 + $0x38] sm:$0xff]  ;;  %v204_v15 = vld [vmem:[#allocation5 + $0x48] sm:$0xff]  ;;  %s885_s28 = scalar_lea.vmem %s1148_s4, 1024  ;;  %s961_s6 = smov [#allocation7]  }
  0x59   : > { %721 = vmatpush3.bf16.msra.mxu0 %v718_v3  ;;  %758 = vmatpush3.bf16.msra.mxu1 %v718_v3  ;;  %v730_v13 = vpack.c.bf16 %v202_v12, %v201_v11  ;;  %v203_v14 = vld [vmem:[#allocation5 + $0x40] sm:$0xff]  ;;  %v205_v17 = vld [vmem:[#allocation5 + $0x50] sm:$0xff]  ;;  %v206_v18 = vld [vmem:[#allocation5 + $0x58] sm:$0xff]  ;;  %p886_p4 = scmp.ne.s32.totalorder %s1148_s4, %s885_s28  ;;  %s889_s7 = sshll.u32 %s961_s6, 4  ;;  %s890_s7 = int_to_ptr.vmem [resolvable:$false] %s889_s7 }
  0x5a   : > { %723 = vmatprep.subr.bf16.mxu0 %v722_v5  ;;  %751 = vmatprep.subr.bf16.mxu1 %v722_v5  ;;  %v734_v16 = vpack.c.bf16 %v204_v15, %v203_v14  ;;  %v738_v19 = vpack.c.bf16 %v206_v18, %v205_v17  ;;  %v207_v20 = vld [vmem:[#allocation5 + $0x60] sm:$0xff]  ;;  %v208_v21 = vld [vmem:[#allocation5 + $0x68] sm:$0xff]  ;;  %v209_v23 = vld [vmem:[#allocation5 + $0x70] sm:$0xff]  ;;  %s891_s20 = scalar_lea.vmem %s890_s7, 2048  ;;  %p892_p11 = scmp.lt.s32.totalorder %s1148_s4, %s890_s7 }
  0x5b   : > { %694 = vmatprep.mubr.f32.mxu0 %v179_v9  ;;  %706 = vmatprep.mubr.f32.mxu1 %v187_v10  ;;  %v742_v22 = vpack.c.bf16 %v208_v21, %v207_v20  ;;  %v210_v24 = vld [vmem:[#allocation5 + $0x78] sm:$0xff]  ;;  %v180_v26 = vld [vmem:[%s1120_s3 + $0x8] sm:$0xff]  ;;  %v181_v28 = vld [vmem:[%s1120_s3 + $0x10] sm:$0xff]  ;;  %p887_p6 = pnand %p886_p4, %p1065_p12  ;;  %p893_p13 = scmp.lt.s32.totalorder %s891_s20, %s885_s28 }
  0x5c   : > { %v746_v25 = vpack.c.bf16 %v210_v24, %v209_v23  ;;  %v188_v27 = vld [vmem:[%s1120_s3 + $0x48] sm:$0xff]  ;;  %v189_v29 = vld [vmem:[%s1120_s3 + $0x50] sm:$0xff]  ;;  %v182_v30 = vld [vmem:[%s1120_s3 + $0x18] sm:$0xff] }
  0x5d   : > { %725 = vmatpush3.bf16.msra.mxu0 %v722_v5  ;;  %759 = vmatpush3.bf16.msra.mxu1 %v722_v5  ;;  %v190_v31 = vld [vmem:[%s1120_s3 + $0x58] sm:$0xff]  ;;  %v183_v32 = vld [vmem:[%s1120_s3 + $0x20] sm:$0xff]  ;;  %v184_v34 = vld [vmem:[%s1120_s3 + $0x28] sm:$0xff]  ;;  %p888_p8 = pneg %p887_p6  ;;  %p894_p3 = por %p893_p13, %p892_p11 }
  0x5e   : > { %727 = vmatprep.subr.bf16.mxu0 %v726_v8  ;;  %752 = vmatprep.subr.bf16.mxu1 %v726_v8  ;;  %v191_v33 = vld [vmem:[%s1120_s3 + $0x60] sm:$0xff]  ;;  %v192_v35 = vld [vmem:[%s1120_s3 + $0x68] sm:$0xff]  ;;  %v185_v36 = vld [vmem:[%s1120_s3 + $0x30] sm:$0xff] }
  0x5f   : > { %v193_v37 = vld [vmem:[%s1120_s3 + $0x70] sm:$0xff]  ;;  %v186_v38 = vld [vmem:[%s1120_s3 + $0x38] sm:$0xff]  ;;  %p895_p7 = pnand %p894_p3, %p888_p8 }
  0x60   : > { %v194_v39 = vld [vmem:[%s1120_s3 + $0x78] sm:$0xff] }
  0x61   : > { %729 = vmatpush3.bf16.msra.mxu0 %v726_v8  ;;  %760 = vmatpush3.bf16.msra.mxu1 %v726_v8 }
  0x62   : > { %731 = vmatprep.subr.bf16.mxu0 %v730_v13  ;;  %753 = vmatprep.subr.bf16.mxu1 %v730_v13 }
  0x65   : > { %733 = vmatpush3.bf16.msra.mxu0 %v730_v13  ;;  %761 = vmatpush3.bf16.msra.mxu1 %v730_v13 }
  0x66   : > { %735 = vmatprep.subr.bf16.mxu0 %v734_v16  ;;  %754 = vmatprep.subr.bf16.mxu1 %v734_v16 }
  0x69   : > { %737 = vmatpush3.bf16.msra.mxu0 %v734_v16  ;;  %762 = vmatpush3.bf16.msra.mxu1 %v734_v16 }
  0x6a   : > { %739 = vmatprep.subr.bf16.mxu0 %v738_v19  ;;  %755 = vmatprep.subr.bf16.mxu1 %v738_v19 }
  0x6d   : > { %741 = vmatpush3.bf16.msra.mxu0 %v738_v19  ;;  %763 = vmatpush3.bf16.msra.mxu1 %v738_v19 }
  0x6e   : > { %743 = vmatprep.subr.bf16.mxu0 %v742_v22  ;;  %756 = vmatprep.subr.bf16.mxu1 %v742_v22 }
  0x71   : > { %745 = vmatpush3.bf16.msra.mxu0 %v742_v22  ;;  %764 = vmatpush3.bf16.msra.mxu1 %v742_v22 }
  0x72   : > { %747 = vmatprep.subr.bf16.mxu0 %v746_v25  ;;  %757 = vmatprep.subr.bf16.mxu1 %v746_v25 }
  0x75   : > { %749 = vmatpush3.bf16.msra.mxu0 %v746_v25  ;;  %765 = vmatpush3.bf16.msra.mxu1 %v746_v25 }
  0x78   : > { %695 = vmatmul.mubr.f32.vlgmr.msra.gmra.mrb[0].mxu0 %v180_v26  ;;  %707 = vmatmul.mubr.f32.vlgmr.msra.gmra.mrb[0].mxu1 %v188_v27 }
  0x79   : > { %697 = vmatprep.mubr.f32.mxu0 %v181_v28  ;;  %709 = vmatprep.mubr.f32.mxu1 %v189_v29 }
  0x7c   : > { %698 = vmatmul.mubr.f32.gmra.mrb[2].mxu0 %v182_v30  ;;  %710 = vmatmul.mubr.f32.gmra.mrb[2].mxu1 %v190_v31 }
  0x7d   : > { %700 = vmatprep.mubr.f32.mxu0 %v183_v32  ;;  %712 = vmatprep.mubr.f32.mxu1 %v191_v33 }
  0x80   : > { %701 = vmatmul.mubr.f32.gmra.mrb[4].mxu0 %v184_v34  ;;  %713 = vmatmul.mubr.f32.gmra.mrb[4].mxu1 %v192_v35 }
  0x81   : > { %703 = vmatprep.mubr.f32.mxu0 %v185_v36  ;;  %715 = vmatprep.mubr.f32.mxu1 %v193_v37 }
  0x84   : > { %704 = vmatmul.mubr.f32.gmra.mrb[6].mxu0 %v186_v38  ;;  %716 = vmatmul.mubr.f32.gmra.mrb[6].mxu1 %v194_v39 }
 0x14b   : > { %v696_v40 = vpop.f32.mrb[0].mxu0  ;;  %v708_v41 = vpop.f32.mrb[0].mxu1 }
 0x14c   : > { %v277_v42 = vpop.f32.mrb[1].mxu0  ;;  %v317_v43 = vpop.f32.mrb[1].mxu1 }
 0x14d   : > { %v586_v44 = vpack.c.bf16 %v696_v40, %v277_v42  ;;  %v606_v45 = vpack.c.bf16 %v708_v41, %v317_v43 }
 0x14f   : > { %587 = vst [vmem:[%s176_s17] sm:$0xff] %v586_v44   ;;  %626 = vst [vmem:[%s176_s17 + $0x20] sm:$0xff] %v606_v45   ;;  %v699_v46 = vpop.f32.mrb[2].mxu0  ;;  %v711_v47 = vpop.f32.mrb[2].mxu1 }
 0x150   : > { %v287_v48 = vpop.f32.mrb[3].mxu0  ;;  %v327_v49 = vpop.f32.mrb[3].mxu1 }
 0x151   : > { %v591_v50 = vpack.c.bf16 %v699_v46, %v287_v48  ;;  %v611_v51 = vpack.c.bf16 %v711_v47, %v327_v49 }
 0x153   : > { %623 = vst [vmem:[%s176_s17 + $0x8] sm:$0xff] %v591_v50   ;;  %627 = vst [vmem:[%s176_s17 + $0x28] sm:$0xff] %v611_v51   ;;  %v702_v52 = vpop.f32.mrb[4].mxu0  ;;  %v714_v53 = vpop.f32.mrb[4].mxu1 }
 0x154   : > { %v297_v54 = vpop.f32.mrb[5].mxu0  ;;  %v337_v55 = vpop.f32.mrb[5].mxu1 }
 0x155   : > { %v596_v56 = vpack.c.bf16 %v702_v52, %v297_v54  ;;  %v616_v57 = vpack.c.bf16 %v714_v53, %v337_v55 }
 0x157   : > { %624 = vst [vmem:[%s176_s17 + $0x10] sm:$0xff] %v596_v56   ;;  %628 = vst [vmem:[%s176_s17 + $0x30] sm:$0xff] %v616_v57   ;;  %v705_v58 = vpop.f32.mrb[6].mxu0  ;;  %v717_v59 = vpop.f32.mrb[6].mxu1 }
 0x158   : > { %v307_v60 = vpop.f32.mrb[7].mxu0  ;;  %v347_v61 = vpop.f32.mrb[7].mxu1 }
 0x159   : > { %v601_v62 = vpack.c.bf16 %v705_v58, %v307_v60  ;;  %v621_v63 = vpack.c.bf16 %v717_v59, %v347_v61 }
 0x15b   : > { %625 = vst [vmem:[%s176_s17 + $0x18] sm:$0xff] %v601_v62   ;;  %629 = vst [vmem:[%s176_s17 + $0x38] sm:$0xff] %v621_v63  }
 0x15c   : > { %898 = shalt.err (!%p895_p7)
}
 0x15d   : > { %s899_s18 = scalar_lea.hbm %s1153_s23, 1024  ;;  %s903_s26 = scalar_lea.hbm %s1198_s2, 5120 }
 0x15e   : > { %p900_p9 = scmp.ne.s32.totalorder %s1153_s23, %s899_s18  ;;  %p904_p5 = scmp.lt.u32.totalorder %s1153_s23, %s1198_s2 }
 0x15f   : > { %p905_p10 = scmp.lt.u32.totalorder %s903_s26, %s899_s18  ;;  %p907_p4 = scmp.lt.u32.totalorder %s899_s18, %s1153_s23 }
 0x160   : > { %p901_p1 = pnand %p900_p9, %p1065_p12 }
 0x161   : > { %p906_p2 = por %p905_p10, %p904_p5 }
 0x162   : > { %p902_p0 = pneg %p901_p1 }
 0x163   : > { %p908_p6 = por %p907_p4, %p906_p2 }
 0x165   : > { %p909_p8 = pnand %p908_p6, %p902_p0 }
 0x167   : > { %912 = shalt.err (!%p909_p8)
}
 0x168   : > { %s962_s3 = smov 64   ;;  %s963_s15 = smov 4  }
 0x169   : > { %772 = dma.vmem_to_hbm [thread:$0]  (%p1065_p12), %s1148_s4, 1024, %s1153_s23, %s437_s13, %s962_s3, %s962_s3, %s963_s15  }
 0x16a PF: > { %p789_p11 = scmp.ge.s32.totalorder %s955_s12, 2  ;;  %s465_s17 = sand.u32 1, %s943_s9  }
 0x16b   : > { %p1213_p13 = scmp.ne.s32.totalorder %s1203_s16, 0  ;;  %s466_s5 = scalar_lea.sflag [#allocation4], %s465_s17 }
 0x16d   : > { %p783_p3 = pnand %p789_p11, %p1213_p13 }
 0x16f   : > { %938 = dma.done.wait (!%p783_p3), %s466_s5, 1024  }
 0x170   : > { %940 = vsyncadd (!%p783_p3), %s466_s5, 4294966272  ;;  %p16_p7 = scmp.ge.s32.totalorder %s1032_s21, 7   ;;  %s1214_s9 = smov %s947_s10 }
 0x171   : > { %s1215_s10 = smov %s951_s11  ;;  %s1216_s11 = smov %s1061_s8 }
 0x172   : > { %s1217_s12 = smov %s1032_s21  ;;  %18 = sbr.rel (!%p16_p7) target bundleno = 6 (0x6), region = 77 }
 0x179   :  { %471 = vsyncpa [#allocation3], 1 }
 0x17a   :  { %473 = vsyncpa [#allocation3 + $0x1], 1 }
 0x17b   :  { %474 = vsyncpa [#allocation6], 1 }
 0x17c   :  { %475 = vsyncpa [#allocation4], 1 }
 0x17d   :  { %477 = vsyncpa [#allocation4 + $0x1], 1 }

</bundles_post_ra>
